<compile_context>
chip_gen: v7x
topology: tpu7x:2x2x1
jax: 0.10.0
libtpu: 0.0.40
codegen_flags: <defaults>
</compile_context>

<pallas_src>
import functools

import jax
import jax.numpy as jnp
from jax.experimental import pallas as pl
from jax.experimental.pallas import tpu as pltpu


def _layernorm_kernel(x_ref, g_ref, b_ref, o_ref, *, eps, inv_dm1):
    # x_ref/o_ref: (bb, ts, D);  g_ref/b_ref: (ts, D), broadcast over batch.
    x = x_ref[...].astype(jnp.float32)

    mean = jnp.mean(x, axis=-1, keepdims=True)                  # (bb, ts, 1)
    diff = x - mean                                             # feeds reduction only
    # torch.std default is UNBIASED (ddof=1).
    var = jnp.sum(diff * diff, axis=-1, keepdims=True) * jnp.float32(inv_dm1)
    std = jnp.sqrt(var)

    # Exact per-row reciprocal: (bb, ts, 1) elements -> trivial cost in an
    # HBM-bound kernel, and it matches PyTorch numerics.
    inv = pl.reciprocal(std + jnp.float32(eps), approx=False)

    gamma = g_ref[...].astype(jnp.float32)                      # (ts, D)
    beta = b_ref[...].astype(jnp.float32)

    # Recompute (x - mean) here instead of reusing `diff`, so only x and the
    # (bb, ts, 1) stats are large live values entering the output phase.
    o_ref[...] = ((x - mean) * (gamma * inv) + beta).astype(o_ref.dtype)


def _default_vmem_limit_bytes():
    """min(64 MiB, 3/4 of physical VMEM): 64 MiB on v5e/v6e, 48 MiB on v7x."""
    try:
        cap = pltpu.get_tpu_info().vmem_capacity_bytes
    except Exception:
        cap = 64 * 1024 * 1024
    return int(min(64 * 1024 * 1024, (cap * 3) // 4))


def _choose_tiling(B, S, D, x_itemsize, p_itemsize, vmem_limit_bytes):
    """Pick (batch_block bb, seq_tile ts) so the pipelined footprint fits VMEM."""
    # Sublane granularity of the narrowest participating dtype:
    # f32 -> 8, bf16/f16 -> 16, int8/fp8 -> 32.
    min_item = min(int(x_itemsize), int(p_itemsize), 4)
    sublane = {4: 8, 2: 16, 1: 32}.get(min_item, 8)

    def footprint(bb, ts):
        io_bytes = 2 * 2 * bb * ts * D * x_itemsize   # x + out, double-buffered
        par_bytes = 2 * 2 * ts * D * p_itemsize       # gamma + beta, double-buffered
        tmp_bytes = 2 * bb * ts * D * 4               # ~two f32 intermediates
        return io_bytes + par_bytes + tmp_bytes

    budget = int(vmem_limit_bytes * 0.7)              # headroom for compiler scratch

    # Prefer keeping the whole batch inside the block (fewer grid steps,
    # gamma/beta fetched exactly once per s-tile); fall back to batch tiling.
    for bb in (B, 1):
        if footprint(bb, S) <= budget:
            return bb, S                              # full seq dim: no (8,128) issue
        ts = budget // max(footprint(bb, 1), 1)
        ts = (ts // sublane) * sublane
        if ts >= sublane:
            return bb, min(int(ts), S)
    return 1, min(sublane, S)                         # last-resort minimal tile


def layer_norm(x, gamma, beta, eps=1e-5, *, vmem_limit_bytes=None):
    """x: (B, S, D); gamma/beta: (S, D). Returns (B, S, D) in x.dtype."""
    B, S, D = x.shape
    assert gamma.shape == (S, D) and beta.shape == (S, D)
    assert D > 1, "unbiased std (ddof=1) needs D > 1 (torch.std would give NaN)"
    # NOTE: D a multiple of 128 -> lane-dense (unmasked) stores; other values
    # still work (full-D block) but lower to masked partial stores.

    if vmem_limit_bytes is None:
        vmem_limit_bytes = _default_vmem_limit_bytes()

    p_itemsize = max(gamma.dtype.itemsize, beta.dtype.itemsize)
    bb, ts = _choose_tiling(B, S, D, x.dtype.itemsize, p_itemsize,
                            vmem_limit_bytes)
    grid = (pl.cdiv(S, ts), pl.cdiv(B, bb))

    kernel = functools.partial(_layernorm_kernel, eps=eps, inv_dm1=1.0 / (D - 1))

    return pl.pallas_call(
        kernel,
        out_shape=jax.ShapeDtypeStruct((B, S, D), x.dtype),
        grid_spec=pltpu.PrefetchScalarGridSpec(
            num_scalar_prefetch=0,
            grid=grid,
            in_specs=[
                pl.BlockSpec((bb, ts, D), lambda s, b: (b, s, 0)),   # x
                pl.BlockSpec((ts, D), lambda s, b: (s, 0)),          # gamma
                pl.BlockSpec((ts, D), lambda s, b: (s, 0)),          # beta
            ],
            out_specs=pl.BlockSpec((bb, ts, D), lambda s, b: (b, s, 0)),
        ),
        compiler_params=pltpu.CompilerParams(
            # Shard the independent s-tile axis across TensorCores (v7x
            # megacore); batch stays innermost/arbitrary so gamma/beta blocks
            # remain resident across it.
            dimension_semantics=("parallel", "arbitrary"),
            vmem_limit_bytes=int(vmem_limit_bytes),
        ),
    )(x, gamma, beta)


def _reference(x, gamma, beta, eps=1e-5):
    xf = x.astype(jnp.float32)
    mean = jnp.mean(xf, axis=-1, keepdims=True)
    var = jnp.sum((xf - mean) ** 2, axis=-1, keepdims=True) / (xf.shape[-1] - 1)
    std = jnp.sqrt(var)
    return (gamma.astype(jnp.float32) * (xf - mean) / (std + eps)
            + beta.astype(jnp.float32))


if __name__ == "__main__":
    key = jax.random.PRNGKey(0)
    kx, kg, kb, kx2, kx3 = jax.random.split(key, 5)

    # 1) Small f32 case; D multiple of 128 -> lane-dense stores.
    B, S, D = 2, 8, 128
    x = jax.random.normal(kx, (B, S, D), dtype=jnp.float32)
    gamma = 1.0 + 0.1 * jax.random.normal(kg, (S, D), dtype=jnp.float32)
    beta = 0.1 * jax.random.normal(kb, (S, D), dtype=jnp.float32)

    out = jax.block_until_ready(layer_norm(x, gamma, beta, eps=1e-5))
    assert out.shape == (B, S, D)
    assert jnp.allclose(out, _reference(x, gamma, beta), atol=1e-5, rtol=1e-5), \
        "f32 mismatch"

    # 2) Module-default S=D=512 with a small forced VMEM limit to exercise
    #    sequence tiling (including a partial last tile).
    S2, D2 = 512, 512
    x2 = jax.random.normal(kx2, (B, S2, D2), dtype=jnp.float32)
    g2 = 1.0 + 0.05 * jax.random.normal(kg, (S2, D2), dtype=jnp.float32)
    b2 = 0.05 * jax.random.normal(kb, (S2, D2), dtype=jnp.float32)
    out2 = jax.block_until_ready(
        layer_norm(x2, g2, b2, eps=1e-5, vmem_limit_bytes=8 * 1024 * 1024))
    assert jnp.allclose(out2, _reference(x2, g2, b2), atol=1e-5, rtol=1e-5), \
        "tiled f32 mismatch"

    # 3) bf16 activations (dtype-aware tiling / sublane-16 path), f32 params.
    S3, D3 = 64, 256
    x3 = jax.random.normal(kx3, (B, S3, D3), dtype=jnp.float32).astype(jnp.bfloat16)
    g3 = jnp.ones((S3, D3), dtype=jnp.float32)
    b3 = jnp.zeros((S3, D3), dtype=jnp.float32)
    out3 = jax.block_until_ready(layer_norm(x3, g3, b3, eps=1e-5))
    assert out3.dtype == jnp.bfloat16
    assert jnp.allclose(out3.astype(jnp.float32), _reference(x3, g3, b3),
                        atol=5e-2, rtol=5e-2), "bf16 mismatch"

    print("KERNEL_OK")
</pallas_src>

<mosaic_0001>
module attributes {stable_mosaic.version = 11 : i64} {
  func.func @_layernorm_kernel(%arg0: i32, %arg1: i32, %arg2: memref<2x8x128xf32, #tpu.memory_space<vmem>>, %arg3: memref<8x128xf32, #tpu.memory_space<vmem>>, %arg4: memref<8x128xf32, #tpu.memory_space<vmem>>, %arg5: memref<2x8x128xf32, #tpu.memory_space<vmem>>) attributes {dimension_semantics = [#tpu.dimension_semantics<parallel>, #tpu.dimension_semantics<arbitrary>], iteration_bounds = array<i64: 1, 1>, scalar_prefetch = 0 : i64, scratch_operands = 0 : i64, tpu.core_type = #tpu.core_type<tc>, window_params = [{transform_indices = @transform_0, window_bounds = array<i64: 2, 8, 128>}, {transform_indices = @transform_1, window_bounds = array<i64: 8, 128>}, {transform_indices = @transform_2, window_bounds = array<i64: 8, 128>}, {transform_indices = @transform_3, window_bounds = array<i64: 2, 8, 128>}]} {
    %c0 = arith.constant 0 : index
    %c0_0 = arith.constant 0 : index
    %c0_1 = arith.constant 0 : index
    %0 = vector.load %arg2[%c0, %c0_0, %c0_1] : memref<2x8x128xf32, #tpu.memory_space<vmem>>, vector<2x8x128xf32>
    %cst = arith.constant dense<0.000000e+00> : vector<2x8xf32>
    %1 = vector.multi_reduction <add>, %0, %cst [2] : vector<2x8x128xf32> to vector<2x8xf32>
    %2 = vector.shape_cast %1 : vector<2x8xf32> to vector<2x8x1xf32>
    %cst_2 = arith.constant 1.280000e+02 : f32
    %3 = vector.broadcast %cst_2 : f32 to vector<2x8x1xf32>
    %4 = arith.divf %2, %3 : vector<2x8x1xf32>
    %5 = vector.broadcast %4 : vector<2x8x1xf32> to vector<2x8x128xf32>
    %6 = arith.subf %0, %5 : vector<2x8x128xf32>
    %7 = arith.mulf %6, %6 : vector<2x8x128xf32>
    %cst_3 = arith.constant dense<0.000000e+00> : vector<2x8xf32>
    %8 = vector.multi_reduction <add>, %7, %cst_3 [2] : vector<2x8x128xf32> to vector<2x8xf32>
    %9 = vector.shape_cast %8 : vector<2x8xf32> to vector<2x8x1xf32>
    %cst_4 = arith.constant 0.00787401571 : f32
    %10 = vector.broadcast %cst_4 : f32 to vector<2x8x1xf32>
    %11 = arith.mulf %9, %10 : vector<2x8x1xf32>
    %12 = math.sqrt %11 : vector<2x8x1xf32>
    %cst_5 = arith.constant 9.99999974E-6 : f32
    %13 = vector.broadcast %cst_5 : f32 to vector<2x8x1xf32>
    %14 = arith.addf %12, %13 : vector<2x8x1xf32>
    %15 = tpu.reciprocal %14 : vector<2x8x1xf32> -> vector<2x8x1xf32>
    %c0_6 = arith.constant 0 : index
    %c0_7 = arith.constant 0 : index
    %16 = vector.load %arg3[%c0_6, %c0_7] : memref<8x128xf32, #tpu.memory_space<vmem>>, vector<8x128xf32>
    %c0_8 = arith.constant 0 : index
    %c0_9 = arith.constant 0 : index
    %17 = vector.load %arg4[%c0_8, %c0_9] : memref<8x128xf32, #tpu.memory_space<vmem>>, vector<8x128xf32>
    %18 = vector.broadcast %4 : vector<2x8x1xf32> to vector<2x8x128xf32>
    %19 = arith.subf %0, %18 : vector<2x8x128xf32>
    %20 = vector.shape_cast %16 : vector<8x128xf32> to vector<1x8x128xf32>
    %21 = vector.broadcast %20 : vector<1x8x128xf32> to vector<2x8x128xf32>
    %22 = vector.broadcast %15 : vector<2x8x1xf32> to vector<2x8x128xf32>
    %23 = arith.mulf %21, %22 : vector<2x8x128xf32>
    %24 = arith.mulf %19, %23 : vector<2x8x128xf32>
    %25 = vector.shape_cast %17 : vector<8x128xf32> to vector<1x8x128xf32>
    %26 = vector.broadcast %25 : vector<1x8x128xf32> to vector<2x8x128xf32>
    %27 = arith.addf %24, %26 : vector<2x8x128xf32>
    %c0_10 = arith.constant 0 : index
    %c0_11 = arith.constant 0 : index
    %c0_12 = arith.constant 0 : index
    %28 = vector.load %arg5[%c0_10, %c0_11, %c0_12] : memref<2x8x128xf32, #tpu.memory_space<vmem>>, vector<2x8x128xf32>
    tpu.vector_store %arg5[%c0_10, %c0_11, %c0_12], %27 {strides = array<i32>} : memref<2x8x128xf32, #tpu.memory_space<vmem>>, vector<2x8x128xf32>,
    return
  }
  func.func @transform_0(%arg0: i32, %arg1: i32) -> (i32, i32, i32) {
    %c0_i32 = arith.constant 0 : i32
    %c0_i32_0 = arith.constant 0 : i32
    return %arg1, %arg0, %c0_i32 : i32, i32, i32
  }
  func.func @transform_1(%arg0: i32, %arg1: i32) -> (i32, i32) {
    %c0_i32 = arith.constant 0 : i32
    %c0_i32_0 = arith.constant 0 : i32
    return %arg0, %c0_i32 : i32, i32
  }
  func.func @transform_2(%arg0: i32, %arg1: i32) -> (i32, i32) {
    %c0_i32 = arith.constant 0 : i32
    %c0_i32_0 = arith.constant 0 : i32
    return %arg0, %c0_i32 : i32, i32
  }
  func.func @transform_3(%arg0: i32, %arg1: i32) -> (i32, i32, i32) {
    %c0_i32 = arith.constant 0 : i32
    %c0_i32_0 = arith.constant 0 : i32
    return %arg1, %arg0, %c0_i32 : i32, i32, i32
  }
}

</mosaic_0001>

<bundles_post_ra>
// kernel: tpu_custom_call.1
= control target key start
LH: loop header
LB: loop body
LE: loop exit
PB: predicated region body
PF: predicated region fallthrough
CT: control target
= control target key end

     0   :  { %8 = vsyncpa [#allocation3], 0  ;;  %s312_s0 = inlined_call_operand.hbm [shape: f32[2,8,128], index: 0, kind: input, shape index: {}]   ;;  %s313_s1 = inlined_call_operand.hbm [shape: f32[8,128], index: 1, kind: input, shape index: {}]   ;;  %s314_s2 = inlined_call_operand.hbm [shape: f32[8,128], index: 2, kind: input, shape index: {}]   ;;  %s315_s3 = inlined_call_operand.hbm [shape: f32[2,8,128], index: 3, kind: output, shape index: {}]  }
   0x1   :  { %9 = vsyncpa [#allocation6], 0 }
   0x2   :  { %10 = vsyncpa [#allocation4], 0  ;;  %s225_s12 = smov [#allocation5]   ;;  %s226_s14 = smov [#allocation2]  }
   0x3   :  { %s29_s13 = sshll.u32 %s225_s12, 4  ;;  %s16_s15 = sshll.u32 %s226_s14, 4  ;;  %s30_s13 = int_to_ptr.vmem [resolvable:$true] %s29_s13  ;;  %s251_s15 = int_to_ptr.vmem [resolvable:$true] %s16_s15 }
   0x4   :  { %s131_s18 = scalar_lea.hbm %s313_s1, 128 }
   0x5   :  { %p132_p0 = scmp.ne.s32.totalorder %s313_s1, %s131_s18  ;;  %p135_p1 = scmp.lt.u32.totalorder %s131_s18, %s313_s1 }
   0x7   :  { %p137_p2 = pnand %p135_p1, %p132_p0 }
   0x9   :  { %140 = shalt.err (!%p137_p2)
}
   0xa   :  { %s141_s23 = scalar_lea.vmem %s30_s13, 128  ;;  %p146_p4 = scmp.lt.s32.totalorder %s30_s13, %s30_s13 }
   0xb   :  { %p142_p3 = scmp.ne.s32.totalorder %s30_s13, %s141_s23  ;;  %p147_p5 = scmp.lt.s32.totalorder %s141_s23, %s141_s23 }
   0xd   :  { %p148_p6 = por %p147_p5, %p146_p4 }
   0xf   :  { %p149_p7 = pnand %p148_p6, %p142_p3 }
  0x11   :  { %152 = shalt.err (!%p149_p7)
}
  0x12   :  { %32 = dma.hbm_to_vmem [thread:$0]  %s313_s1, 128, %s30_s13, [#allocation6]  }
  0x13   :  { %s153_s28 = scalar_lea.hbm %s312_s0, 256 }
  0x14   :  { %p154_p8 = scmp.ne.s32.totalorder %s312_s0, %s153_s28  ;;  %p157_p9 = scmp.lt.u32.totalorder %s153_s28, %s312_s0 }
  0x16   :  { %p159_p10 = pnand %p157_p9, %p154_p8 }
  0x18   :  { %162 = shalt.err (!%p159_p10)
}
  0x19   :  { %s163_s6 = scalar_lea.vmem %s251_s15, 256  ;;  %p168_p12 = scmp.lt.s32.totalorder %s251_s15, %s251_s15 }
  0x1a   :  { %p164_p11 = scmp.ne.s32.totalorder %s251_s15, %s163_s6  ;;  %p169_p13 = scmp.lt.s32.totalorder %s163_s6, %s163_s6 }
  0x1c   :  { %p170_p0 = por %p169_p13, %p168_p12 }
  0x1e   :  { %p171_p1 = pnand %p170_p0, %p164_p11 }
  0x20   :  { %174 = shalt.err (!%p171_p1)
}
  0x21   :  { %s227_s1 = smov 128   ;;  %s228_s7 = smov 8  }
  0x22   :  { %22 = dma.hbm_to_vmem [thread:$0]  %s312_s0, 256, %s251_s15, [#allocation3], %s227_s1, %s227_s1, %s228_s7  }
  0x23   :  { %s229_s10 = smov [#allocation7]   ;;  %s175_s14 = scalar_lea.hbm %s314_s2, 128 }
  0x24   :  { %s39_s11 = sshll.u32 %s229_s10, 4  ;;  %p176_p2 = scmp.ne.s32.totalorder %s314_s2, %s175_s14  ;;  %s40_s11 = int_to_ptr.vmem [resolvable:$true] %s39_s11 }
  0x25   :  { %p179_p3 = scmp.lt.u32.totalorder %s175_s14, %s314_s2 }
  0x27   :  { %p181_p4 = pnand %p179_p3, %p176_p2 }
  0x29   :  { %184 = shalt.err (!%p181_p4)
}
  0x2a   :  { %s185_s20 = scalar_lea.vmem %s40_s11, 128  ;;  %p190_p6 = scmp.lt.s32.totalorder %s40_s11, %s40_s11 }
  0x2b   :  { %p186_p5 = scmp.ne.s32.totalorder %s40_s11, %s185_s20  ;;  %p191_p7 = scmp.lt.s32.totalorder %s185_s20, %s185_s20 }
  0x2d   :  { %p192_p8 = por %p191_p7, %p190_p6 }
  0x2f   :  { %p193_p9 = pnand %p192_p8, %p186_p5 }
  0x31   :  { %196 = shalt.err (!%p193_p9)
}
  0x32   :  { %42 = dma.hbm_to_vmem [thread:$0]  %s314_s2, 128, %s40_s11, [#allocation6]  }
  0x33   :  { %219 = dma.done.wait [#allocation3], 256  }
  0x34   :  { %220 = vsyncadd [#allocation3], 4294967040 }
  0x35   :  { %221 = dma.done.wait [#allocation6], 256  }
  0x36   :  { %222 = vsyncadd [#allocation6], 4294967040  ;;  %v52_v0 = vld [vmem:[#allocation2] sm:$0xff]  ;;  %v53_v1 = vld [vmem:[#allocation2 + $0x8] sm:$0xff]  ;;  %s230_s2 = smov [#allocation8]  }
  0x37   :  { %54 = vadd.xlane.f32.xlu0 %v52_v0  ;;  %v89_v26 = vld [vmem:[#allocation5] sm:$0xff]  ;;  %v90_v29 = vld [vmem:[#allocation7] sm:$0xff]  ;;  %s104_s21 = sshll.u32 %s230_s2, 4  ;;  %s105_s21 = int_to_ptr.vmem [resolvable:$true] %s104_s21 }
  0x38   :  { %s197_s22 = scalar_lea.vmem %s105_s21, 256  ;;  %p202_p11 = scmp.lt.s32.totalorder %s105_s21, %s105_s21 }
  0x39   :  { %p198_p10 = scmp.ne.s32.totalorder %s105_s21, %s197_s22  ;;  %p203_p12 = scmp.lt.s32.totalorder %s197_s22, %s197_s22 }
  0x3b   :  { %56 = vadd.xlane.f32.xlu0 %v53_v1  ;;  %p204_p13 = por %p203_p12, %p202_p11 }
  0x3d   :  { %p205_p0 = pnand %p204_p13, %p198_p10 }
  0xc4   :  { %v55_v2 = vpop.xlane.xlu0 %54 }
  0xc5   :  { %v59_v3 = vmul.f32 0.0078125, %v55_v2 }
  0xc7   :  { %v61_v4 = vsub.f32 %v52_v0, %v59_v3 }
  0xc8   :  { %v57_v5 = vpop.xlane.xlu0 %56 }
  0xc9   :  { %v60_v6 = vmul.f32 0.0078125, %v57_v5  ;;  %v63_v7 = vmul.f32 %v61_v4, %v61_v4 }
  0xcb   :  { %v62_v8 = vsub.f32 %v53_v1, %v60_v6  ;;  %65 = vadd.xlane.f32.xlu1 %v63_v7 }
  0xcd   :  { %v64_v9 = vmul.f32 %v62_v8, %v62_v8 }
  0xcf   :  { %67 = vadd.xlane.f32.xlu1 %v64_v9 }
 0x158   :  { %v66_v10 = vpop.xlane.xlu1 %65 }
 0x159   :  { %v69_v11 = vmul.f32 0.007874016, %v66_v10 }
 0x15b   :  { %123 = vrsqrt.f32 %v69_v11  ;;  %vm73_vm0 = vcmp.eq.f32.partialorder %v69_v11, inf  ;;  %v76_v16 = vand.u32 2147483648, %v69_v11  ;;  %vm75_vm1 = vcmp.eq.f32.partialorder %v69_v11, 0.0 }
 0x15c   :  { %v68_v12 = vpop.xlane.xlu1 %67 }
 0x15d   :  { %v70_v13 = vmul.f32 0.007874016, %v68_v12 }
 0x15f   :  { %125 = vrsqrt.f32 %v70_v13  ;;  %vm80_vm2 = vcmp.eq.f32.partialorder %v70_v13, inf  ;;  %v83_v22 = vand.u32 2147483648, %v70_v13  ;;  %vm82_vm3 = vcmp.eq.f32.partialorder %v70_v13, 0.0 }
 0x165   :  { %v124_v14 = vpop.eup %123 }
 0x166   :  { %v72_v15 = vmul.f32 %v124_v14, %v69_v11 }
 0x168   :  { %v74_v17 = vsel %vm73_vm0, %v69_v11, %v72_v15 }
 0x169   :  { %v126_v18 = vpop.eup %125  ;;  %v77_v19 = vsel %vm75_vm1, %v76_v16, %v74_v17 }
 0x16a   :  { %v79_v20 = vmul.f32 %v126_v18, %v70_v13  ;;  %v85_v21 = vadd.f32 1e-05, %v77_v19 }
 0x16c   :  { %v81_v23 = vsel %vm80_vm2, %v70_v13, %v79_v20  ;;  %127 = vrcp.f32 %v85_v21 }
 0x16d   :  { %v84_v24 = vsel %vm82_vm3, %v83_v22, %v81_v23 }
 0x16e   :  { %v86_v25 = vadd.f32 1e-05, %v84_v24 }
 0x170   :  { %129 = vrcp.f32 %v86_v25 }
 0x176   :  { %v128_v27 = vpop.eup %127 }
 0x177   :  { %v91_v28 = vmul.f32 %v128_v27, %v89_v26 }
 0x179   :  { %v93_v30 = vmul.f32 %v91_v28, %v61_v4 }
 0x17a   :  { %v130_v31 = vpop.eup %129 }
 0x17b   :  { %v92_v32 = vmul.f32 %v130_v31, %v89_v26  ;;  %v95_v33 = vadd.f32 %v93_v30, %v90_v29 }
 0x17d   :  { %v94_v34 = vmul.f32 %v92_v32, %v62_v8  ;;  %97 = vst [vmem:[#allocation8] sm:$0xff] %v95_v33 }
 0x17f   :  { %v96_v35 = vadd.f32 %v94_v34, %v90_v29 }
 0x181   :  { %98 = vst [vmem:[#allocation8 + $0x8] sm:$0xff] %v96_v35 }
 0x182   :  { %208 = shalt.err (!%p205_p0)
}
 0x183   :  { %s209_s25 = scalar_lea.hbm %s315_s3, 256 }
 0x184   :  { %p210_p1 = scmp.ne.s32.totalorder %s315_s3, %s209_s25  ;;  %p213_p2 = scmp.lt.u32.totalorder %s209_s25, %s315_s3 }
 0x186   :  { %p215_p3 = pnand %p213_p2, %p210_p1 }
 0x188   :  { %218 = shalt.err (!%p215_p3)
}
 0x189   :  { %110 = dma.vmem_to_hbm [thread:$0]  %s105_s21, 256, %s315_s3, [#allocation4], %s227_s1, %s227_s1, %s228_s7  }
 0x18a   :  { %223 = dma.done.wait [#allocation4], 256  }
 0x18b   :  { %224 = vsyncadd [#allocation4], 4294967040 }
 0x18c   :  { %114 = vsyncpa [#allocation3], 1 }
 0x18d   :  { %115 = vsyncpa [#allocation6], 1 }
 0x18e   :  { %116 = vsyncpa [#allocation4], 1 }

</bundles_post_ra>
